<compile_context>
chip_gen: v7x
topology: tpu7x:2x2x1
jax: 0.10.0
libtpu: 0.0.40
codegen_flags: <defaults>
</compile_context>

<pallas_src>
import functools
import math

import jax
import jax.numpy as jnp
from jax import lax
from jax.experimental import pallas as pl
from jax.experimental.pallas import tpu as pltpu

# Contract the feature axis of both operands ("NT" matmul): (8,F) x (TB,F) -> (8,TB)
_NT_DIMS = (((1,), (1,)), ((), ()))


def lr_kernel(x_ref, w_ref, b_ref, o_ref, *, precision=None):
    # x_ref: (TB, F) VMEM  -- one batch tile (auto double-buffered by the grid)
    # w_ref: (8, F)  VMEM  -- lane-dense weight rows (row 0 real), resident across steps
    # b_ref: (1,)    SMEM  -- bias scalar
    # o_ref: (1, TB) VMEM  -- lane-dense output row for this batch tile
    x = x_ref[...]
    w = w_ref[...]
    # Memory-bound kernel: extra MXU passes from a higher `precision` are free;
    # pass precision=lax.Precision.HIGHEST via lr_forward if bit-closeness to
    # a full-f32 reference matters for large num_features.
    zs = lax.dot_general(
        w, x, _NT_DIMS, precision=precision, preferred_element_type=jnp.float32
    )  # (8, TB)
    z = zs[0:1, :] + b_ref[0]  # (1, TB)
    o_ref[...] = jax.nn.sigmoid(z).astype(o_ref.dtype)


def _round_up(n, m):
    return ((n + m - 1) // m) * m


def _vmem_limit_bytes():
    """Generation-aware scoped-VMEM limit (v7x: 64 MiB/TC vs 128 MiB on v5e/v6e)."""
    phys = 64 * 1024 * 1024  # conservative fallback = smallest physical VMEM (v7x per-TC)
    try:
        phys = int(pltpu.get_tpu_info().vmem_capacity_bytes)
    except Exception:
        pass
    # Leave headroom for Mosaic internal scratch; never request more than 96 MiB.
    return min((phys * 3) // 4, 96 * 1024 * 1024)


def lr_forward(x, weight, bias, *, block_rows=None, precision=None):
    """Forward of LR: sigmoid(x @ weight.T + bias).

    x: (B, F) f32; weight: (1, F) f32 (PyTorch nn.Linear layout); bias: (1,) f32.
    Returns (B, 1) f32.
    """
    B, F = x.shape
    assert weight.shape == (1, F) and bias.shape == (1,)

    row_bytes = 4 * F  # one f32 feature row
    vmem_limit = _vmem_limit_bytes()
    # Budget for the double-buffered x tiles: total limit minus the (double-buffered)
    # weight slab plus a margin for the output double buffer / internal scratch.
    misc = 2 * 8 * row_bytes + (1 << 20)
    x_pair_budget = vmem_limit - misc
    # TODO(synk): for num_features so large that even a 128-row double buffer does
    # not fit, add a feature (K) grid axis with a VMEM accumulator
    # (pl.when(k==0) init / pl.when(k==last) sigmoid+store) instead of one slab.
    assert x_pair_budget >= 2 * 128 * row_bytes, (
        f"num_features={F} too large for a single feature slab in VMEM "
        f"(limit={vmem_limit} bytes)"
    )
    tb_cap = (x_pair_budget // (2 * row_bytes)) // 128 * 128

    if block_rows is None:
        # Target ~8 MiB per x tile so the ~0.35 us per-grid-step overhead is
        # negligible even at v7x's 3.2 TB/s HBM bandwidth.
        tb = max(128, ((8 << 20) // row_bytes) // 128 * 128)
        if B >= 4 * 128:
            # Keep at least ~4 tiles in flight so the DMA pipeline (and v7x's two
            # TensorCores) have work to overlap, as long as tiles stay >=128 rows.
            tb = min(tb, max(128, _round_up(pl.cdiv(B, 4), 128)))
    else:
        tb = max(128, _round_up(int(block_rows), 128))
    tb = min(tb, tb_cap)
    tb = min(tb, _round_up(B, 128))  # don't over-tile tiny batches

    num_tiles = pl.cdiv(B, tb)
    # v7x shards the "parallel" batch axis across its two TensorCores; an even
    # tile count balances them.  Best effort only (keeps tiles >= 128 rows).
    if num_tiles > 1 and num_tiles % 2 == 1:
        tb_even = max(128, _round_up(pl.cdiv(B, num_tiles + 1), 128))
        if pl.cdiv(B, tb_even) % 2 == 0 and tb_even <= tb_cap:
            tb = tb_even
            num_tiles = pl.cdiv(B, tb)

    # Output is over-allocated to a whole number of tiles (x itself is NEVER
    # padded/copied); the extra columns hold garbage and are sliced off below.
    b_pad = num_tiles * tb

    # Lane-dense weight slab: full f32 sublane tile (8 rows), row 0 is the real weight.
    w8 = jnp.pad(weight, ((0, 7), (0, 0)))

    out_row = pl.pallas_call(
        functools.partial(lr_kernel, precision=precision),
        out_shape=jax.ShapeDtypeStruct((1, b_pad), x.dtype),
        grid=(num_tiles,),
        in_specs=[
            # x: one batch tile per step; the grid need not divide B -- Pallas
            # handles the partial final block (no full-array pad / HBM copy).
            pl.BlockSpec((tb, F), lambda i: (i, 0)),
            pl.BlockSpec((8, F), lambda i: (0, 0)),             # weight: constant index -> resident
            pl.BlockSpec(memory_space=pltpu.MemorySpace.SMEM),  # bias scalar in SMEM
        ],
        out_specs=pl.BlockSpec((1, tb), lambda i: (0, i)),      # lane-dense output row
        compiler_params=pltpu.CompilerParams(
            # Batch tiles are independent.  NOTE: if profiling on v7x shows only
            # one TensorCore issuing DMAs, switch this axis to pltpu.CORE_PARALLEL.
            dimension_semantics=("parallel",),
            vmem_limit_bytes=vmem_limit,
        ),
    )(x, w8, bias)

    return out_row[0, :B].reshape(B, 1)


if __name__ == "__main__":
    # Small shapes consistent with LR(num_features): (batch, num_features).
    # batch is NOT a multiple of the 128-row tile -> exercises the partial tail
    # block (no input padding).
    batch, num_features = 300, 256

    key = jax.random.PRNGKey(0)
    kx, kw, kb = jax.random.split(key, 3)

    # nn.Linear default init: U(-1/sqrt(fan_in), 1/sqrt(fan_in)) for weight and bias.
    bound = 1.0 / math.sqrt(num_features)
    weight = jax.random.uniform(kw, (1, num_features), jnp.float32, -bound, bound)
    bias = jax.random.uniform(kb, (1,), jnp.float32, -bound, bound)
    x = jax.random.normal(kx, (batch, num_features), jnp.float32)

    # Plain-JAX reference of the PyTorch forward.
    ref = jax.nn.sigmoid(
        jnp.dot(x, weight.T, precision=lax.Precision.HIGHEST) + bias
    )

    # 1) Auto-sized tiles (single ragged tile at this small batch).
    out_auto = lr_forward(x, weight, bias)
    jax.block_until_ready(out_auto)
    # 2) Forced 128-row tiles -> 3 grid steps including a partial (44-row) final block.
    out_tiled = lr_forward(x, weight, bias, block_rows=128)
    jax.block_until_ready(out_tiled)

    for out in (out_auto, out_tiled):
        assert out.shape == (batch, 1), out.shape
        assert jnp.allclose(out, ref, atol=1e-3, rtol=1e-3), float(
            jnp.max(jnp.abs(out - ref))
        )

    print("KERNEL_OK")
</pallas_src>

<mosaic_0001>
module attributes {stable_mosaic.version = 11 : i64} {
  func.func @lr_kernel(%arg0: i32, %arg1: memref<384x256xf32, #tpu.memory_space<vmem>>, %arg2: memref<8x256xf32, #tpu.memory_space<vmem>>, %arg3: memref<1xf32, #tpu.memory_space<smem>>, %arg4: memref<1x384xf32, #tpu.memory_space<vmem>>) attributes {dimension_semantics = [#tpu.dimension_semantics<parallel>], iteration_bounds = array<i64: 1>, scalar_prefetch = 0 : i64, scratch_operands = 0 : i64, tpu.core_type = #tpu.core_type<tc>, window_params = [{transform_indices = @transform_0, window_bounds = array<i64: 384, 256>}, {pipeline_mode = #tpu.pipeline_mode<synchronous>, transform_indices = @transform_1, window_bounds = array<i64: 8, 256>}, {transform_indices = @transform_2, window_bounds = array<i64: 1>}, {transform_indices = @transform_3, window_bounds = array<i64: 1, 384>}]} {
    %c0 = arith.constant 0 : index
    %c0_0 = arith.constant 0 : index
    %0 = vector.load %arg1[%c0, %c0_0] : memref<384x256xf32, #tpu.memory_space<vmem>>, vector<384x256xf32>
    %c0_1 = arith.constant 0 : index
    %c0_2 = arith.constant 0 : index
    %1 = vector.load %arg2[%c0_1, %c0_2] : memref<8x256xf32, #tpu.memory_space<vmem>>, vector<8x256xf32>
    %cst = arith.constant dense<0.000000e+00> : vector<8x384xf32>
    %2 = tpu.matmul %1, %0, %cst {dimension_numbers = #tpu.dot_dimension_numbers<[1], [1], [0], [0], [0, 0, 1, 0], [], []>} : vector<8x256xf32>, vector<384x256xf32>, vector<8x384xf32> -> vector<8x384xf32>
    %3 = vector.extract_strided_slice %2 {offsets = [0, 0], sizes = [1, 384], strides = [1, 1]} : vector<8x384xf32> to vector<1x384xf32>
    %c0_3 = arith.constant 0 : index
    %4 = memref.load %arg3[%c0_3] : memref<1xf32, #tpu.memory_space<smem>>
    %5 = vector.broadcast %4 : f32 to vector<1x384xf32>
    %6 = arith.addf %3, %5 : vector<1x384xf32>
    %7 = arith.negf %6 : vector<1x384xf32>
    %8 = math.exp %7 : vector<1x384xf32>
    %cst_4 = arith.constant 1.000000e+00 : f32
    %9 = vector.broadcast %cst_4 : f32 to vector<1x384xf32>
    %10 = arith.addf %9, %8 : vector<1x384xf32>
    %11 = arith.divf %9, %10 : vector<1x384xf32>
    %c0_5 = arith.constant 0 : index
    %c0_6 = arith.constant 0 : index
    %12 = vector.load %arg4[%c0_5, %c0_6] : memref<1x384xf32, #tpu.memory_space<vmem>>, vector<1x384xf32>
    tpu.vector_store %arg4[%c0_5, %c0_6], %11 {strides = array<i32>} : memref<1x384xf32, #tpu.memory_space<vmem>>, vector<1x384xf32>,
    return
  }
  func.func @transform_0(%arg0: i32) -> (i32, i32) {
    %c0_i32 = arith.constant 0 : i32
    %c0_i32_0 = arith.constant 0 : i32
    return %arg0, %c0_i32 : i32, i32
  }
  func.func @transform_1(%arg0: i32) -> (i32, i32) {
    %c0_i32 = arith.constant 0 : i32
    %c0_i32_0 = arith.constant 0 : i32
    %c0_i32_1 = arith.constant 0 : i32
    return %c0_i32, %c0_i32_0 : i32, i32
  }
  func.func @transform_2(%arg0: i32) -> i32 {
    %c0_i32 = arith.constant 0 : i32
    %c0_i32_0 = arith.constant 0 : i32
    return %c0_i32 : i32
  }
  func.func @transform_3(%arg0: i32) -> (i32, i32) {
    %c0_i32 = arith.constant 0 : i32
    %c0_i32_0 = arith.constant 0 : i32
    return %c0_i32, %arg0 : i32, i32
  }
}

</mosaic_0001>

<bundles_post_ra>
// kernel: tpu_custom_call.1
= control target key start
LH: loop header
LB: loop body
LE: loop exit
PB: predicated region body
PF: predicated region fallthrough
CT: control target
= control target key end

     0   :  { %9 = vsyncpa [#allocation4], 0  ;;  %s606_s0 = inlined_call_operand.hbm [shape: f32[300,256], index: 0, kind: input, shape index: {}]   ;;  %s607_s1 = inlined_call_operand.hbm [shape: f32[8,256], index: 1, kind: input, shape index: {}]   ;;  %s608_s2 = inlined_call_operand.<no memory space> [shape: f32[1], index: 2, kind: input, shape index: {}]   ;;  %s609_s3 = inlined_call_operand.hbm [shape: f32[1,384], index: 3, kind: output, shape index: {}]  }
   0x1   :  { %10 = vsyncpa [#allocation7], 0 }
   0x2   :  { %11 = vsyncpa [#allocation5], 0 }
   0x3   :  { %16 = vsyncadd [#allocation4], 2560  ;;  %s541_s12 = smov [#allocation3]   ;;  %s469_s16 = scalar_lea.hbm %s606_s0, 9728 }
   0x4   :  { %s17_s13 = sshll.u32 %s541_s12, 4  ;;  %p470_p0 = scmp.ne.s32.totalorder %s606_s0, %s469_s16  ;;  %s18_s13 = int_to_ptr.vmem [resolvable:$true] %s17_s13 }
   0x5   :  { %p473_p1 = scmp.lt.u32.totalorder %s469_s16, %s606_s0 }
   0x7   :  { %p475_p2 = pnand %p473_p1, %p470_p0 }
   0x9   :  { %478 = shalt.err (!%p475_p2)
}
   0xa   :  { %s479_s21 = scalar_lea.vmem %s18_s13, 9728  ;;  %s483_s22 = scalar_lea.vmem %s18_s13, 12288 }
   0xb   :  { %p480_p3 = scmp.ne.s32.totalorder %s18_s13, %s479_s21  ;;  %p484_p4 = scmp.lt.s32.totalorder %s18_s13, %s18_s13 }
   0xc   :  { %p485_p5 = scmp.lt.s32.totalorder %s483_s22, %s479_s21 }
   0xe   :  { %p486_p6 = por %p485_p5, %p484_p4 }
  0x10   :  { %p487_p7 = pnand %p486_p6, %p480_p3 }
  0x12   :  { %490 = shalt.err (!%p487_p7)
}
  0x13   :  { %s542_s23 = smov 256   ;;  %s543_s24 = smov 16  }
  0x14   :  { %23 = dma.hbm_to_vmem [thread:$0]  %s606_s0, 9728, %s18_s13, [#allocation4], %s542_s23, %s542_s23, %s543_s24  }
  0x15   :  { %s544_s27 = smov [#allocation6]   ;;  %s491_s4 = scalar_lea.hbm %s607_s1, 256 }
  0x16   :  { %s30_s28 = sshll.u32 %s544_s27, 4  ;;  %p492_p8 = scmp.ne.s32.totalorder %s607_s1, %s491_s4  ;;  %s31_s28 = int_to_ptr.vmem [resolvable:$true] %s30_s28 }
  0x17   :  { %p495_p9 = scmp.lt.u32.totalorder %s491_s4, %s607_s1 }
  0x19   :  { %p497_p10 = pnand %p495_p9, %p492_p8 }
  0x1b   :  { %500 = shalt.err (!%p497_p10)
}
  0x1c   :  { %s501_s9 = scalar_lea.vmem %s31_s28, 256  ;;  %p506_p12 = scmp.lt.s32.totalorder %s31_s28, %s31_s28 }
  0x1d   :  { %p502_p11 = scmp.ne.s32.totalorder %s31_s28, %s501_s9  ;;  %p507_p13 = scmp.lt.s32.totalorder %s501_s9, %s501_s9 }
  0x1f   :  { %p508_p0 = por %p507_p13, %p506_p12 }
  0x21   :  { %p509_p1 = pnand %p508_p0, %p502_p11 }
  0x23   :  { %512 = shalt.err (!%p509_p1)
}
  0x24   :  { %33 = dma.hbm_to_vmem [thread:$0]  %s607_s1, 256, %s31_s28, [#allocation7]  }
  0x25   :  { %535 = dma.done.wait [#allocation4], 12288  }
  0x26   :  { %536 = vsyncadd [#allocation4], 4294955008 }
  0x27   :  { %537 = dma.done.wait [#allocation7], 256  }
  0x28   :  { %538 = vsyncadd [#allocation7], 4294967040  ;;  %v43_v0 = vld [vmem:[#allocation3 + $0x8] sm:$0xff]  ;;  %v45_v1 = vld [vmem:[#allocation3 + $0x18] sm:$0xff] }
  0x29   :  { %v42_v2 = vld [vmem:[#allocation3] sm:$0xff]  ;;  %v355_v3 = vpack.c.bf16 %v45_v1, %v43_v0  ;;  %v44_v4 = vld [vmem:[#allocation3 + $0x10] sm:$0xff]  ;;  %v47_v5 = vld [vmem:[#allocation3 + $0x28] sm:$0xff] }
  0x2a   :  { %v49_v6 = vld [vmem:[#allocation3 + $0x38] sm:$0xff]  ;;  %v357_v7 = vpack.c.bf16 %v44_v4, %v42_v2  ;;  %v46_v9 = vld [vmem:[#allocation3 + $0x20] sm:$0xff]  ;;  %v48_v10 = vld [vmem:[#allocation3 + $0x30] sm:$0xff] }
  0x2b   :  { %v359_v8 = vpack.c.bf16 %v49_v6, %v47_v5  ;;  %356 = vmatprep.subr.bf16.mxu0 %v355_v3  ;;  %v51_v11 = vld [vmem:[#allocation3 + $0x48] sm:$0xff]  ;;  %v53_v12 = vld [vmem:[#allocation3 + $0x58] sm:$0xff]  ;;  %v361_v13 = vpack.c.bf16 %v48_v10, %v46_v9  ;;  %v106_v17 = vld [vmem:[#allocation3 + $0x200] sm:$0xff] }
  0x2c   :  { %358 = vmatpush1.bf16.xpose.msra.mxu0 %v357_v7  ;;  %v363_v14 = vpack.c.bf16 %v53_v12, %v51_v11  ;;  %v107_v15 = vld [vmem:[#allocation3 + $0x208] sm:$0xff]  ;;  %v109_v16 = vld [vmem:[#allocation3 + $0x218] sm:$0xff]  ;;  %v50_v18 = vld [vmem:[#allocation3 + $0x40] sm:$0xff] }
  0x2d   :  { %360 = vmatprep.subr.bf16.mxu0 %v359_v8  ;;  %v52_v19 = vld [vmem:[#allocation3 + $0x50] sm:$0xff]  ;;  %v419_v20 = vpack.c.bf16 %v109_v16, %v107_v15  ;;  %v55_v22 = vld [vmem:[#allocation3 + $0x68] sm:$0xff]  ;;  %v57_v23 = vld [vmem:[#allocation3 + $0x78] sm:$0xff] }
  0x2e   :  { %v108_v21 = vld [vmem:[#allocation3 + $0x210] sm:$0xff]  ;;  %v111_v25 = vld [vmem:[#allocation3 + $0x228] sm:$0xff]  ;;  %v113_v26 = vld [vmem:[#allocation3 + $0x238] sm:$0xff]  ;;  %v365_v27 = vpack.c.bf16 %v52_v19, %v50_v18  ;;  %v367_v29 = vpack.c.bf16 %v57_v23, %v55_v22 }
  0x2f   :  { %v421_v24 = vpack.c.bf16 %v108_v21, %v106_v17  ;;  %420 = vmatprep.subr.bf16.mxu1 %v419_v20  ;;  %v423_v28 = vpack.c.bf16 %v113_v26, %v111_v25  ;;  %v110_v30 = vld [vmem:[#allocation3 + $0x220] sm:$0xff]  ;;  %v112_v31 = vld [vmem:[#allocation3 + $0x230] sm:$0xff]  ;;  %v115_v32 = vld [vmem:[#allocation3 + $0x248] sm:$0xff] }
  0x30   :  { %v117_v33 = vld [vmem:[#allocation3 + $0x258] sm:$0xff]  ;;  %v425_v34 = vpack.c.bf16 %v112_v31, %v110_v30  ;;  %v54_v35 = vld [vmem:[#allocation3 + $0x60] sm:$0xff]  ;;  %v56_v36 = vld [vmem:[#allocation3 + $0x70] sm:$0xff] }
  0x31   :  { %422 = vmatpush1.bf16.xpose.msra.mxu1 %v421_v24  ;;  %v427_v37 = vpack.c.bf16 %v117_v33, %v115_v32  ;;  %v59_v38 = vld [vmem:[#allocation3 + $0x88] sm:$0xff]  ;;  %v61_v39 = vld [vmem:[#allocation3 + $0x98] sm:$0xff]  ;;  %v369_v40 = vpack.c.bf16 %v56_v36, %v54_v35  ;;  %v114_v42 = vld [vmem:[#allocation3 + $0x240] sm:$0xff] }
  0x32   :  { %424 = vmatprep.subr.bf16.mxu1 %v423_v28  ;;  %v371_v41 = vpack.c.bf16 %v61_v39, %v59_v38  ;;  %v116_v43 = vld [vmem:[#allocation3 + $0x250] sm:$0xff]  ;;  %v119_v44 = vld [vmem:[#allocation3 + $0x268] sm:$0xff]  ;;  %v121_v45 = vld [vmem:[#allocation3 + $0x278] sm:$0xff] }
  0x33   :  { %v429_v46 = vpack.c.bf16 %v116_v43, %v114_v42  ;;  %v58_v47 = vld [vmem:[#allocation3 + $0x80] sm:$0xff]  ;;  %v60_v48 = vld [vmem:[#allocation3 + $0x90] sm:$0xff]  ;;  %v431_v49 = vpack.c.bf16 %v121_v45, %v119_v44  ;;  %v63_v50 = vld [vmem:[#allocation3 + $0xa8] sm:$0xff] }
  0x34   :  { %362 = vmatpush1.bf16.xpose.msra.mxu0 %v361_v13  ;;  %v65_v51 = vld [vmem:[#allocation3 + $0xb8] sm:$0xff]  ;;  %v373_v52 = vpack.c.bf16 %v60_v48, %v58_v47  ;;  %v139_v53 = vld [vmem:[#allocation6 + $0x8] sm:$0xff]  ;;  %v118_v55 = vld [vmem:[#allocation3 + $0x260] sm:$0xff] }
  0x35   :  { %364 = vmatprep.subr.bf16.mxu0 %v363_v14  ;;  %v375_v54 = vpack.c.bf16 %v65_v51, %v63_v50  ;;  %v120_v56 = vld [vmem:[#allocation3 + $0x270] sm:$0xff]  ;;  %204 = vmatprep.mubr.f32.mxu0 %v139_v53  ;;  %v123_v57 = vld [vmem:[#allocation3 + $0x288] sm:$0xff]  ;;  %v125_v58 = vld [vmem:[#allocation3 + $0x298] sm:$0xff] }
  0x36   :  { %275 = vmatprep.mubr.f32.mxu1 %v139_v53  ;;  %v433_v59 = vpack.c.bf16 %v120_v56, %v118_v55  ;;  %v62_v60 = vld [vmem:[#allocation3 + $0xa0] sm:$0xff]  ;;  %v64_v61 = vld [vmem:[#allocation3 + $0xb0] sm:$0xff]  ;;  %v435_v62 = vpack.c.bf16 %v125_v58, %v123_v57  ;;  %v67_v63 = vld [vmem:[#allocation3 + $0xc8] sm:$0xff] }
  0x37   :  { %v69_v0 = vld [vmem:[#allocation3 + $0xd8] sm:$0xff]  ;;  %v377_v1 = vpack.c.bf16 %v64_v61, %v62_v60  ;;  %v122_v3 = vld [vmem:[#allocation3 + $0x280] sm:$0xff]  ;;  %v124_v4 = vld [vmem:[#allocation3 + $0x290] sm:$0xff] }
  0x38   :  { %v379_v2 = vpack.c.bf16 %v69_v0, %v67_v63  ;;  %v127_v5 = vld [vmem:[#allocation3 + $0x2a8] sm:$0xff]  ;;  %v129_v6 = vld [vmem:[#allocation3 + $0x2b8] sm:$0xff]  ;;  %v437_v7 = vpack.c.bf16 %v124_v4, %v122_v3  ;;  %v66_v8 = vld [vmem:[#allocation3 + $0xc0] sm:$0xff] }
  0x39   :  { %426 = vmatpush1.bf16.xpose.msra.mxu1 %v425_v34  ;;  %v68_v9 = vld [vmem:[#allocation3 + $0xd0] sm:$0xff]  ;;  %v439_v10 = vpack.c.bf16 %v129_v6, %v127_v5  ;;  %v71_v11 = vld [vmem:[#allocation3 + $0xe8] sm:$0xff]  ;;  %v73_v12 = vld [vmem:[#allocation3 + $0xf8] sm:$0xff] }
  0x3a   :  { %428 = vmatprep.subr.bf16.mxu1 %v427_v37  ;;  %v381_v13 = vpack.c.bf16 %v68_v9, %v66_v8  ;;  %v383_v14 = vpack.c.bf16 %v73_v12, %v71_v11  ;;  %v126_v15 = vld [vmem:[#allocation3 + $0x2a0] sm:$0xff]  ;;  %v128_v16 = vld [vmem:[#allocation3 + $0x2b0] sm:$0xff]  ;;  %v131_v17 = vld [vmem:[#allocation3 + $0x2c8] sm:$0xff] }
  0x3b   :  { %v133_v18 = vld [vmem:[#allocation3 + $0x2d8] sm:$0xff]  ;;  %v441_v19 = vpack.c.bf16 %v128_v16, %v126_v15  ;;  %v70_v20 = vld [vmem:[#allocation3 + $0xe0] sm:$0xff]  ;;  %v72_v21 = vld [vmem:[#allocation3 + $0xf0] sm:$0xff] }
  0x3c   :  { %366 = vmatpush1.bf16.xpose.msra.mxu0 %v365_v27  ;;  %v443_v22 = vpack.c.bf16 %v133_v18, %v131_v17  ;;  %v75_v23 = vld [vmem:[#allocation3 + $0x108] sm:$0xff]  ;;  %v77_v24 = vld [vmem:[#allocation3 + $0x118] sm:$0xff]  ;;  %v385_v25 = vpack.c.bf16 %v72_v21, %v70_v20  ;;  %v130_v27 = vld [vmem:[#allocation3 + $0x2c0] sm:$0xff]  ;;  %v282_v20 = vstv %s608_s2  ;;  %s546_s2 = smov [#allocation8]  }
  0x3d   :  { %368 = vmatprep.subr.bf16.mxu0 %v367_v29  ;;  %v387_v26 = vpack.c.bf16 %v77_v24, %v75_v23  ;;  %v132_v28 = vld [vmem:[#allocation3 + $0x2d0] sm:$0xff]  ;;  %v135_v29 = vld [vmem:[#allocation3 + $0x2e8] sm:$0xff]  ;;  %v137_v30 = vld [vmem:[#allocation3 + $0x2f8] sm:$0xff]  ;;  %s342_s12 = sshll.u32 %s546_s2, 4  ;;  %s343_s12 = int_to_ptr.vmem [resolvable:$true] %s342_s12 }
  0x3e   :  { %v445_v31 = vpack.c.bf16 %v132_v28, %v130_v27  ;;  %v74_v32 = vld [vmem:[#allocation3 + $0x100] sm:$0xff]  ;;  %v76_v33 = vld [vmem:[#allocation3 + $0x110] sm:$0xff]  ;;  %v447_v34 = vpack.c.bf16 %v137_v30, %v135_v29  ;;  %v79_v35 = vld [vmem:[#allocation3 + $0x128] sm:$0xff]  ;;  %s513_s13 = scalar_lea.vmem %s343_s12, 48  ;;  %s517_s14 = scalar_lea.vmem %s343_s12, 64 }
  0x3f   :  { %v81_v36 = vld [vmem:[#allocation3 + $0x138] sm:$0xff]  ;;  %v389_v37 = vpack.c.bf16 %v76_v33, %v74_v32  ;;  %v134_v39 = vld [vmem:[#allocation3 + $0x2e0] sm:$0xff]  ;;  %v80_v43 = vld [vmem:[#allocation3 + $0x130] sm:$0xff]  ;;  %p514_p2 = scmp.ne.s32.totalorder %s343_s12, %s513_s13  ;;  %p518_p3 = scmp.lt.s32.totalorder %s343_s12, %s343_s12 }
  0x40   :  { %v391_v38 = vpack.c.bf16 %v81_v36, %v79_v35  ;;  %v78_v42 = vld [vmem:[#allocation3 + $0x120] sm:$0xff]  ;;  %v83_v44 = vld [vmem:[#allocation3 + $0x148] sm:$0xff]  ;;  %v85_v45 = vld [vmem:[#allocation3 + $0x158] sm:$0xff]  ;;  %v545_v35 = vmov 1966171168   ;;  %p519_p4 = scmp.lt.s32.totalorder %s517_s14, %s513_s13 }
  0x41   :  { %430 = vmatpush1.bf16.xpose.msra.mxu1 %v429_v46  ;;  %v393_v46 = vpack.c.bf16 %v80_v43, %v78_v42  ;;  %v395_v47 = vpack.c.bf16 %v85_v45, %v83_v44  ;;  %v82_v48 = vld [vmem:[#allocation3 + $0x140] sm:$0xff]  ;;  %v87_v50 = vld [vmem:[#allocation3 + $0x168] sm:$0xff]  ;;  %v89_v51 = vld [vmem:[#allocation3 + $0x178] sm:$0xff]  ;;  %v309_v36 = vunpack.c.l.s4 %v545_v35 }
  0x42   :  { %432 = vmatprep.subr.bf16.mxu1 %v431_v49  ;;  %v84_v49 = vld [vmem:[#allocation3 + $0x150] sm:$0xff]  ;;  %v86_v55 = vld [vmem:[#allocation3 + $0x160] sm:$0xff]  ;;  %v91_v57 = vld [vmem:[#allocation3 + $0x188] sm:$0xff]  ;;  %p520_p5 = por %p519_p4, %p518_p3 }
  0x43   :  { %v397_v53 = vpack.c.bf16 %v84_v49, %v82_v48  ;;  %v88_v56 = vld [vmem:[#allocation3 + $0x170] sm:$0xff]  ;;  %v93_v58 = vld [vmem:[#allocation3 + $0x198] sm:$0xff]  ;;  %v90_v61 = vld [vmem:[#allocation3 + $0x180] sm:$0xff] }
  0x44   :  { %370 = vmatpush1.bf16.xpose.msra.mxu0 %v369_v40  ;;  %v136_v40 = vld [vmem:[#allocation3 + $0x2f0] sm:$0xff]  ;;  %v403_v60 = vpack.c.bf16 %v93_v58, %v91_v57  ;;  %v95_v63 = vld [vmem:[#allocation3 + $0x1a8] sm:$0xff]  ;;  %v97_v0 = vld [vmem:[#allocation3 + $0x1b8] sm:$0xff]  ;;  %p521_p6 = pnand %p520_p5, %p514_p2 }
  0x45   :  { %372 = vmatprep.subr.bf16.mxu0 %v371_v41  ;;  %v449_v41 = vpack.c.bf16 %v136_v40, %v134_v39  ;;  %v94_v3 = vld [vmem:[#allocation3 + $0x1a0] sm:$0xff]  ;;  %v96_v4 = vld [vmem:[#allocation3 + $0x1b0] sm:$0xff]  ;;  %v99_v5 = vld [vmem:[#allocation3 + $0x1c8] sm:$0xff] }
  0x46   :  { %v101_v6 = vld [vmem:[#allocation3 + $0x1d8] sm:$0xff]  ;;  %v98_v9 = vld [vmem:[#allocation3 + $0x1c0] sm:$0xff]  ;;  %v103_v11 = vld [vmem:[#allocation3 + $0x1e8] sm:$0xff] }
  0x47   :  { %v411_v8 = vpack.c.bf16 %v101_v6, %v99_v5  ;;  %v105_v12 = vld [vmem:[#allocation3 + $0x1f8] sm:$0xff]  ;;  %v102_v15 = vld [vmem:[#allocation3 + $0x1e0] sm:$0xff]  ;;  %v104_v16 = vld [vmem:[#allocation3 + $0x1f0] sm:$0xff] }
  0x48   :  { %v417_v17 = vpack.c.bf16 %v104_v16, %v102_v15 }
  0x49   :  { %434 = vmatpush1.bf16.xpose.msra.mxu1 %v433_v59  ;;  %v401_v59 = vpack.c.bf16 %v88_v56, %v86_v55 }
  0x4a   :  { %436 = vmatprep.subr.bf16.mxu1 %v435_v62  ;;  %v92_v62 = vld [vmem:[#allocation3 + $0x190] sm:$0xff] }
  0x4c   :  { %374 = vmatpush1.bf16.xpose.msra.mxu0 %v373_v52  ;;  %v138_v52 = vld [vmem:[#allocation6] sm:$0xff] }
  0x4d   :  { %376 = vmatprep.subr.bf16.mxu0 %v375_v54  ;;  %v399_v54 = vpack.c.bf16 %v89_v51, %v87_v50 }
  0x51   :  { %438 = vmatpush1.bf16.xpose.msra.mxu1 %v437_v7  ;;  %v409_v7 = vpack.c.bf16 %v96_v4, %v94_v3 }
  0x52   :  { %440 = vmatprep.subr.bf16.mxu1 %v439_v10  ;;  %v100_v10 = vld [vmem:[#allocation3 + $0x1d0] sm:$0xff] }
  0x54   :  { %378 = vmatpush1.bf16.xpose.msra.mxu0 %v377_v1  ;;  %v405_v1 = vpack.c.bf16 %v92_v62, %v90_v61 }
  0x55   :  { %380 = vmatprep.subr.bf16.mxu0 %v379_v2  ;;  %v407_v2 = vpack.c.bf16 %v97_v0, %v95_v63 }
  0x59   :  { %442 = vmatpush1.bf16.xpose.msra.mxu1 %v441_v19 }
  0x5a   :  { %444 = vmatprep.subr.bf16.mxu1 %v443_v22 }
  0x5c   :  { %382 = vmatpush1.bf16.xpose.msra.mxu0 %v381_v13  ;;  %v413_v13 = vpack.c.bf16 %v100_v10, %v98_v9 }
  0x5d   :  { %384 = vmatprep.subr.bf16.mxu0 %v383_v14  ;;  %v415_v14 = vpack.c.bf16 %v105_v12, %v103_v11 }
  0x61   :  { %446 = vmatpush1.bf16.xpose.msra.mxu1 %v445_v31 }
  0x62   :  { %448 = vmatprep.subr.bf16.mxu1 %v447_v34 }
  0x64   :  { %386 = vmatpush1.bf16.xpose.msra.mxu0 %v385_v25 }
  0x65   :  { %388 = vmatprep.subr.bf16.mxu0 %v387_v26 }
  0x69   :  { %450 = vmatpush1.bf16.xpose.msra.mxu1 %v449_v41 }
  0x6c   :  { %390 = vmatpush1.bf16.xpose.msra.mxu0 %v389_v37  ;;  %v311_v37 = vlaneseq }
  0x6d   :  { %392 = vmatprep.subr.bf16.mxu0 %v391_v38  ;;  %v310_v38 = vunpack.c.0.s8 %v309_v36 }
  0x6e   :  { %v312_v39 = vshrl.u32 %v311_v37, 7  ;;  %vm333_vm0 = vcmp.lt.s32.totalorder %v311_v37, 384 }
  0x70   :  { %276 = vmatmul.mubr.f32.vlgmr.msra.gmra.mrb[0].mxu1 %v138_v52  ;;  %v313_v40 = vsub.s32 %v310_v38, %v312_v39 }
  0x74   :  { %394 = vmatpush1.bf16.xpose.msra.mxu0 %v393_v46 }
  0x75   :  { %396 = vmatprep.subr.bf16.mxu0 %v395_v47 }
  0x7c   :  { %398 = vmatpush1.bf16.xpose.msra.mxu0 %v397_v53 }
  0x7d   :  { %400 = vmatprep.subr.bf16.mxu0 %v399_v54 }
  0x84   :  { %402 = vmatpush1.bf16.xpose.msra.mxu0 %v401_v59 }
  0x85   :  { %404 = vmatprep.subr.bf16.mxu0 %v403_v60 }
  0x8c   :  { %406 = vmatpush1.bf16.xpose.msra.mxu0 %v405_v1 }
  0x8d   :  { %408 = vmatprep.subr.bf16.mxu0 %v407_v2 }
  0x94   :  { %410 = vmatpush1.bf16.xpose.msra.mxu0 %v409_v7 }
  0x95   :  { %412 = vmatprep.subr.bf16.mxu0 %v411_v8 }
  0x9c   :  { %414 = vmatpush1.bf16.xpose.msra.mxu0 %v413_v13 }
  0x9d   :  { %416 = vmatprep.subr.bf16.mxu0 %v415_v14 }
  0xa4   :  { %418 = vmatpush1.bf16.xpose.msra.mxu0 %v417_v17 }
  0xab   :  { %205 = vmatmul.mubr.f32.vlgmr.msra.gmra.mrb[0].mxu0 %v138_v52 }
 0x143   :  { %v277_v18 = vpop.f32.mrb[0].mxu1 }
 0x144   :  { %v279_v19 = vpop.f32.mrb[1].mxu1  ;;  %v285_v21 = vadd.f32 %v282_v20, %v277_v18 }
 0x146   :  { %v354_v22 = vmul.f32 -1.442695, %v285_v21 }
 0x148   :  { %457 = vpow2.f32 %v354_v22 }
 0x152   :  { %v458_v29 = vpop.eup %457 }
 0x153   :  { %v297_v30 = vadd.f32 1.0, %v458_v29 }
 0x17e   :  { %v206_v23 = vpop.f32.mrb[0].mxu0 }
 0x17f   :  { %v283_v24 = vadd.f32 %v282_v20, %v206_v23  ;;  %v208_v25 = vpop.f32.mrb[1].mxu0 }
 0x180   :  { %v284_v26 = vadd.f32 %v282_v20, %v208_v25 }
 0x181   :  { %v352_v27 = vmul.f32 -1.442695, %v283_v24 }
 0x182   :  { %v353_v28 = vmul.f32 -1.442695, %v284_v26 }
 0x183   :  { %459 = vpow2.f32 %v352_v27 }
 0x184   :  { %461 = vpow2.f32 %v353_v28 }
 0x185   :  { %463 = vrcp.f32 %v297_v30 }
 0x18d   :  { %v460_v31 = vpop.eup %459 }
 0x18e   :  { %v462_v32 = vpop.eup %461  ;;  %v295_v33 = vadd.f32 1.0, %v460_v31 }
 0x18f   :  { %v296_v34 = vadd.f32 1.0, %v462_v32  ;;  %v464_v41 = vpop.eup %463 }
 0x190   :  { %465 = vrcp.f32 %v295_v33  ;;  %v321_v45 = vrot.slane %v464_v41, %v313_v40 }
 0x191   :  { %467 = vrcp.f32 %v296_v34 }
 0x19a   :  { %v466_v42 = vpop.eup %465 }
 0x19b   :  { %v468_v43 = vpop.eup %467 }
 0x19c   :  { %v307_v44 = vcombine.low %v466_v42, %v468_v43 }
 0x19e   :  { %v314_v46 = vrot.slane %v307_v44, %v313_v40 }
 0x1a0   :  { %v322_v47 = vcombine.low %v314_v46, %v321_v45 }
 0x1a2   :  { %v329_v48 = vrot.slane %v322_v47, %v313_v40 }
 0x1a4   :  { %335 = vst.msk [vmem:[#allocation8] sm:$0x7] %vm333_vm0, %v329_v48 }
 0x1a5   :  { %524 = shalt.err (!%p521_p6)
}
 0x1a6   :  { %s525_s17 = scalar_lea.hbm %s609_s3, 48 }
 0x1a7   :  { %p526_p7 = scmp.ne.s32.totalorder %s609_s3, %s525_s17  ;;  %p529_p8 = scmp.lt.u32.totalorder %s525_s17, %s609_s3 }
 0x1a9   :  { %p531_p9 = pnand %p529_p8, %p526_p7 }
 0x1ab   :  { %534 = shalt.err (!%p531_p9)
}
 0x1ac   :  { %345 = dma.vmem_to_hbm [thread:$0]  %s343_s12, 48, %s609_s3, [#allocation5]  }
 0x1ad   :  { %539 = dma.done.wait [#allocation5], 48  }
 0x1ae   :  { %540 = vsyncadd [#allocation5], 4294967248 }
 0x1af   :  { %349 = vsyncpa [#allocation4], 1 }
 0x1b0   :  { %350 = vsyncpa [#allocation7], 1 }
 0x1b1   :  { %351 = vsyncpa [#allocation5], 1 }

</bundles_post_ra>
